<compile_context>
chip_gen: v5e
topology: v5e:2x2
jax: 0.10.0
libtpu: 0.0.40
codegen_flags: <defaults>
</compile_context>

<pallas_src>
import functools

import jax
import jax.numpy as jnp
from jax.experimental import pallas as pl
from jax.experimental.pallas import tpu as pltpu


HIDDEN = 128
LANE = 128


def _round_up(n, m):
    return (n + m - 1) // m * m


def _cdiv(a, b):
    return (a + b - 1) // b


def _pick_batch_tile(B, block_b):
    """Batch tile size + padded batch.

    - each tile <= block_b
    - >= 2 grid steps when B is big enough (v7x: two TensorCores share the
      "parallel" batch axis; v5e/v6e are single-TC so extra steps are cheap)
    - tb multiple of 16 (f32 and bf16 sublane packing), tail padding bounded.
    """
    min_tiles = 2 if B > 32 else 1
    n_tiles = max(_cdiv(B, block_b), min_tiles)
    tb = _round_up(_cdiv(B, n_tiles), 16)
    b_pad = _round_up(B, tb)
    return tb, b_pad


def actor_critic_kernel(x_ref, w1_ref, b1_ref, w2_ref, b2_ref, wh_ref, bh_ref,
                        out_ref, *, output_dim, n_out):
    """Fused MLP: fc1+ReLU -> fc2+ReLU -> fused (actor | critic) head.

    Output is [TB, n_out] (n_out = round_up(output_dim+1, 8)):
      lanes [0, output_dim)          -> actor softmax probabilities
      lane  output_dim               -> critic value
      lanes (output_dim, n_out)      -> zeros (zero-padded head weights/bias)
    """
    x = x_ref[...]

    # fc1 + ReLU (MXU, f32 accumulation, f32 elementwise).  K = input_dim (no pad).
    h1 = jnp.dot(x, w1_ref[...], preferred_element_type=jnp.float32) + b1_ref[...]
    h1 = jnp.maximum(h1, 0.0)

    # fc2 + ReLU.  Cast activations to the weight dtype so bf16 weights give a
    # pure-bf16 MXU pass (no-op for the f32 path).
    h2 = jnp.dot(h1.astype(w2_ref.dtype), w2_ref[...],
                 preferred_element_type=jnp.float32) + b2_ref[...]
    h2 = jnp.maximum(h2, 0.0)

    # Single fused head matmul: [TB,128] @ [128,n_head_pad] = actor logits | critic.
    heads = jnp.dot(h2.astype(wh_ref.dtype), wh_ref[...],
                    preferred_element_type=jnp.float32) + bh_ref[...]

    lane = jax.lax.broadcasted_iota(jnp.int32, heads.shape, dimension=1)
    is_actor = lane < output_dim

    # Numerically-stable softmax restricted to the actor lanes (exact divide:
    # EUP/VPU have slack; exact probs are safer for PPO log-prob math).
    logits = jnp.where(is_actor, heads, -1e30)
    m = jnp.max(logits, axis=-1, keepdims=True)
    e = jnp.where(is_actor, jnp.exp(logits - m), 0.0)
    denom = jnp.sum(e, axis=-1, keepdims=True)
    probs = e / denom

    result = jnp.where(is_actor, probs, heads)
    # Narrow store: only the first n_out lanes leave the kernel.
    out_ref[...] = result[:, :n_out]


def prepare_params(params, compute_dtype=jnp.bfloat16):
    """One-time (per parameter update) weight fusion / casting.

    Hoisted out of the jitted forward so per-step wrapper HLOs stay minimal.
    Returns (prepared_dict, output_dim).
    """
    output_dim = params["wa"].shape[1]
    n_heads = output_dim + 1
    n_head_pad = _round_up(n_heads, LANE)     # fused head matmul stays 128-lane
    cdt = compute_dtype

    wh = jnp.zeros((HIDDEN, n_head_pad), cdt)
    wh = wh.at[:, :output_dim].set(params["wa"].astype(cdt))
    wh = wh.at[:, output_dim:n_heads].set(params["wc"].astype(cdt))

    bh = jnp.zeros((1, n_head_pad), jnp.float32)
    bh = bh.at[:, :output_dim].set(params["ba"].astype(jnp.float32))
    bh = bh.at[:, output_dim:n_heads].set(params["bc"].astype(jnp.float32))

    prepared = {
        "w1": params["w1"].astype(cdt),                 # [input_dim, 128]
        "b1": params["b1"].astype(jnp.float32),         # [1, 128]
        "w2": params["w2"].astype(cdt),                 # [128, 128]
        "b2": params["b2"].astype(jnp.float32),         # [1, 128]
        "wh": wh,                                       # [128, n_head_pad]
        "bh": bh,                                       # [1, n_head_pad]
    }
    return prepared, output_dim


@functools.partial(jax.jit, static_argnames=("output_dim", "block_b"))
def actor_critic_forward(x, prepared, *, output_dim, block_b=1024):
    """Fused forward pass.

    x: [B, input_dim] float32 observations.
    prepared: dict from prepare_params (matmul operands in f32 or bf16).
    Returns: (actor_probs [B, output_dim], critic_value [B, 1]) in float32.
    """
    B, input_dim = x.shape
    n_heads = output_dim + 1
    n_out = _round_up(n_heads, 8)             # narrow lane-count output array

    w1, b1 = prepared["w1"], prepared["b1"]
    w2, b2 = prepared["w2"], prepared["b2"]
    wh, bh = prepared["wh"], prepared["bh"]
    n_head_pad = wh.shape[1]
    cdt = w1.dtype

    tb, b_pad = _pick_batch_tile(B, block_b)
    if b_pad == B and x.dtype == cdt:
        xp = x
    else:
        xp = jnp.zeros((b_pad, input_dim), cdt).at[:B].set(x.astype(cdt))
    # NOTE: pad rows (B..b_pad) produce finite garbage and are sliced away below;
    # never reduce over the raw padded output.

    grid = (b_pad // tb,)

    def resident(shape):                      # weights/biases stay pinned in VMEM
        return pl.BlockSpec(shape, lambda i: (0, 0))

    bytes_in = (xp.size * xp.dtype.itemsize
                + sum(a.size * a.dtype.itemsize for a in (w1, b1, w2, b2, wh, bh)))
    bytes_out = b_pad * n_out * 4
    cost = pl.CostEstimate(
        flops=2 * b_pad * (input_dim * HIDDEN + HIDDEN * HIDDEN + HIDDEN * n_head_pad),
        transcendentals=b_pad * output_dim,
        bytes_accessed=int(bytes_in + bytes_out),
    )

    out = pl.pallas_call(
        functools.partial(actor_critic_kernel, output_dim=output_dim, n_out=n_out),
        out_shape=jax.ShapeDtypeStruct((b_pad, n_out), jnp.float32),
        grid=grid,
        in_specs=[
            pl.BlockSpec((tb, input_dim), lambda i: (i, 0)),  # x: batch-tiled, no lane pad
            resident((input_dim, HIDDEN)),                    # w1
            resident((1, HIDDEN)),                            # b1
            resident((HIDDEN, HIDDEN)),                       # w2
            resident((1, HIDDEN)),                            # b2
            resident((HIDDEN, n_head_pad)),                   # fused head weight [wa|wc]
            resident((1, n_head_pad)),                        # fused head bias   [ba|bc]
        ],
        out_specs=pl.BlockSpec((tb, n_out), lambda i: (i, 0)),
        compiler_params=pltpu.CompilerParams(
            dimension_semantics=("parallel",)),
        cost_estimate=cost,
    )(xp, w1, b1, w2, b2, wh, bh)

    actor = out[:B, :output_dim]
    critic = out[:B, output_dim:n_heads]
    return actor, critic


def init_params(key, input_dim, output_dim):
    """Deterministic init mimicking nn.Linear's U(-1/sqrt(fan_in), 1/sqrt(fan_in))."""
    def linear(k, fan_in, fan_out):
        kw, kb = jax.random.split(k)
        bound = 1.0 / jnp.sqrt(jnp.float32(fan_in))
        w = jax.random.uniform(kw, (fan_in, fan_out), jnp.float32, -bound, bound)
        b = jax.random.uniform(kb, (1, fan_out), jnp.float32, -bound, bound)
        return w, b

    k1, k2, k3, k4 = jax.random.split(key, 4)
    w1, b1 = linear(k1, input_dim, HIDDEN)
    w2, b2 = linear(k2, HIDDEN, HIDDEN)
    wa, ba = linear(k3, HIDDEN, output_dim)
    wc, bc = linear(k4, HIDDEN, 1)
    return {"w1": w1, "b1": b1, "w2": w2, "b2": b2,
            "wa": wa, "ba": ba, "wc": wc, "bc": bc}


def reference_forward(x, params):
    """Pure-JAX reference for correctness check."""
    h1 = jnp.maximum(x @ params["w1"] + params["b1"], 0.0)
    h2 = jnp.maximum(h1 @ params["w2"] + params["b2"], 0.0)
    logits = h2 @ params["wa"] + params["ba"]
    actor = jax.nn.softmax(logits, axis=-1)
    critic = h2 @ params["wc"] + params["bc"]
    return actor, critic


if __name__ == "__main__":
    key = jax.random.PRNGKey(0)
    k_params, k_x = jax.random.split(key)

    batch = 8
    input_dim = 16    # observation dimension
    output_dim = 4    # number of discrete actions

    params = init_params(k_params, input_dim, output_dim)
    x = jax.random.normal(k_x, (batch, input_dim), jnp.float32)

    ref_actor, ref_critic = reference_forward(x, params)

    # f32 operand path: exact on every TPU generation.
    prepared_f32, odim = prepare_params(params, compute_dtype=jnp.float32)
    actor, critic = actor_critic_forward(x, prepared_f32, output_dim=odim)
    jax.block_until_ready((actor, critic))
    assert actor.shape == (batch, output_dim)
    assert critic.shape == (batch, 1)
    assert jnp.allclose(actor, ref_actor, atol=1e-5, rtol=1e-5)
    assert jnp.allclose(critic, ref_critic, atol=1e-4, rtol=1e-4)
    assert jnp.allclose(jnp.sum(actor, axis=-1), 1.0, atol=1e-5)

    # Default bf16 MXU-operand path (f32 accumulate + f32 elementwise):
    # documented accuracy tradeoff, acceptable for RL rollouts.
    prepared_bf16, _ = prepare_params(params)   # compute_dtype=bfloat16 default
    actor_bf, critic_bf = actor_critic_forward(x, prepared_bf16, output_dim=odim)
    jax.block_until_ready((actor_bf, critic_bf))
    assert jnp.allclose(actor_bf, ref_actor, atol=2e-2, rtol=2e-2)
    assert jnp.allclose(critic_bf, ref_critic, atol=5e-2, rtol=5e-2)
    assert jnp.allclose(jnp.sum(actor_bf, axis=-1), 1.0, atol=1e-4)

    print("KERNEL_OK")
</pallas_src>

<mosaic_0001>
module attributes {stable_mosaic.version = 11 : i64} {
  func.func @actor_critic_kernel(%arg0: i32, %arg1: memref<16x16xf32, #tpu.memory_space<vmem>>, %arg2: memref<16x128xf32, #tpu.memory_space<vmem>>, %arg3: memref<1x128xf32, #tpu.memory_space<vmem>>, %arg4: memref<128x128xf32, #tpu.memory_space<vmem>>, %arg5: memref<1x128xf32, #tpu.memory_space<vmem>>, %arg6: memref<128x128xf32, #tpu.memory_space<vmem>>, %arg7: memref<1x128xf32, #tpu.memory_space<vmem>>, %arg8: memref<16x8xf32, #tpu.memory_space<vmem>>) attributes {dimension_semantics = [#tpu.dimension_semantics<parallel>], iteration_bounds = array<i64: 1>, scalar_prefetch = 0 : i64, scratch_operands = 0 : i64, tpu.core_type = #tpu.core_type<tc>, window_params = [{transform_indices = @transform_0, window_bounds = array<i64: 16, 16>}, {pipeline_mode = #tpu.pipeline_mode<synchronous>, transform_indices = @transform_1, window_bounds = array<i64: 16, 128>}, {pipeline_mode = #tpu.pipeline_mode<synchronous>, transform_indices = @transform_2, window_bounds = array<i64: 1, 128>}, {pipeline_mode = #tpu.pipeline_mode<synchronous>, transform_indices = @transform_3, window_bounds = array<i64: 128, 128>}, {pipeline_mode = #tpu.pipeline_mode<synchronous>, transform_indices = @transform_4, window_bounds = array<i64: 1, 128>}, {pipeline_mode = #tpu.pipeline_mode<synchronous>, transform_indices = @transform_5, window_bounds = array<i64: 128, 128>}, {pipeline_mode = #tpu.pipeline_mode<synchronous>, transform_indices = @transform_6, window_bounds = array<i64: 1, 128>}, {transform_indices = @transform_7, window_bounds = array<i64: 16, 8>}]} {
    %c0 = arith.constant 0 : index
    %c0_0 = arith.constant 0 : index
    %0 = vector.load %arg1[%c0, %c0_0] : memref<16x16xf32, #tpu.memory_space<vmem>>, vector<16x16xf32>
    %c0_1 = arith.constant 0 : index
    %c0_2 = arith.constant 0 : index
    %1 = vector.load %arg2[%c0_1, %c0_2] : memref<16x128xf32, #tpu.memory_space<vmem>>, vector<16x128xf32>
    %cst = arith.constant dense<0.000000e+00> : vector<16x128xf32>
    %2 = tpu.matmul %0, %1, %cst {dimension_numbers = #tpu.dot_dimension_numbers<[1], [0], [0], [1], [0, 0, 1, 1], [], []>} : vector<16x16xf32>, vector<16x128xf32>, vector<16x128xf32> -> vector<16x128xf32>
    %c0_3 = arith.constant 0 : index
    %c0_4 = arith.constant 0 : index
    %3 = vector.load %arg3[%c0_3, %c0_4] : memref<1x128xf32, #tpu.memory_space<vmem>>, vector<1x128xf32>
    %4 = vector.broadcast %3 : vector<1x128xf32> to vector<16x128xf32>
    %5 = arith.addf %2, %4 : vector<16x128xf32>
    %cst_5 = arith.constant 0.000000e+00 : f32
    %6 = vector.broadcast %cst_5 : f32 to vector<16x128xf32>
    %7 = arith.maximumf %5, %6 : vector<16x128xf32>
    %c0_6 = arith.constant 0 : index
    %c0_7 = arith.constant 0 : index
    %8 = vector.load %arg4[%c0_6, %c0_7] : memref<128x128xf32, #tpu.memory_space<vmem>>, vector<128x128xf32>
    %cst_8 = arith.constant dense<0.000000e+00> : vector<16x128xf32>
    %9 = tpu.matmul %7, %8, %cst_8 {dimension_numbers = #tpu.dot_dimension_numbers<[1], [0], [0], [1], [0, 0, 1, 1], [], []>} : vector<16x128xf32>, vector<128x128xf32>, vector<16x128xf32> -> vector<16x128xf32>
    %c0_9 = arith.constant 0 : index
    %c0_10 = arith.constant 0 : index
    %10 = vector.load %arg5[%c0_9, %c0_10] : memref<1x128xf32, #tpu.memory_space<vmem>>, vector<1x128xf32>
    %11 = vector.broadcast %10 : vector<1x128xf32> to vector<16x128xf32>
    %12 = arith.addf %9, %11 : vector<16x128xf32>
    %cst_11 = arith.constant 0.000000e+00 : f32
    %13 = vector.broadcast %cst_11 : f32 to vector<16x128xf32>
    %14 = arith.maximumf %12, %13 : vector<16x128xf32>
    %c0_12 = arith.constant 0 : index
    %c0_13 = arith.constant 0 : index
    %15 = vector.load %arg6[%c0_12, %c0_13] : memref<128x128xf32, #tpu.memory_space<vmem>>, vector<128x128xf32>
    %cst_14 = arith.constant dense<0.000000e+00> : vector<16x128xf32>
    %16 = tpu.matmul %14, %15, %cst_14 {dimension_numbers = #tpu.dot_dimension_numbers<[1], [0], [0], [1], [0, 0, 1, 1], [], []>} : vector<16x128xf32>, vector<128x128xf32>, vector<16x128xf32> -> vector<16x128xf32>
    %c0_15 = arith.constant 0 : index
    %c0_16 = arith.constant 0 : index
    %17 = vector.load %arg7[%c0_15, %c0_16] : memref<1x128xf32, #tpu.memory_space<vmem>>, vector<1x128xf32>
    %18 = vector.broadcast %17 : vector<1x128xf32> to vector<16x128xf32>
    %19 = arith.addf %16, %18 : vector<16x128xf32>
    %20 = tpu.iota {dimensions = array<i32: 1>} : vector<16x128xi32>
    %c4_i32 = arith.constant 4 : i32
    %21 = vector.broadcast %c4_i32 : i32 to vector<16x128xi32>
    %22 = arith.cmpi slt, %20, %21 : vector<16x128xi32>
    %cst_17 = arith.constant -1.000000e+30 : f32
    %23 = vector.broadcast %cst_17 : f32 to vector<16x128xf32>
    %24 = arith.select %22, %19, %23 : vector<16x128xi1>, vector<16x128xf32>
    %cst_18 = arith.constant dense<0xFF800000> : vector<16xf32>
    %25 = vector.multi_reduction <maximumf>, %24, %cst_18 [1] : vector<16x128xf32> to vector<16xf32>
    %26 = vector.shape_cast %25 : vector<16xf32> to vector<16x1xf32>
    %27 = vector.broadcast %26 : vector<16x1xf32> to vector<16x128xf32>
    %28 = arith.subf %24, %27 : vector<16x128xf32>
    %29 = math.exp %28 : vector<16x128xf32>
    %cst_19 = arith.constant 0.000000e+00 : f32
    %30 = vector.broadcast %cst_19 : f32 to vector<16x128xf32>
    %31 = arith.select %22, %29, %30 : vector<16x128xi1>, vector<16x128xf32>
    %cst_20 = arith.constant dense<0.000000e+00> : vector<16xf32>
    %32 = vector.multi_reduction <add>, %31, %cst_20 [1] : vector<16x128xf32> to vector<16xf32>
    %33 = vector.shape_cast %32 : vector<16xf32> to vector<16x1xf32>
    %34 = vector.broadcast %33 : vector<16x1xf32> to vector<16x128xf32>
    %35 = arith.divf %31, %34 : vector<16x128xf32>
    %36 = arith.select %22, %35, %19 : vector<16x128xi1>, vector<16x128xf32>
    %37 = vector.extract_strided_slice %36 {offsets = [0, 0], sizes = [16, 8], strides = [1, 1]} : vector<16x128xf32> to vector<16x8xf32>
    %c0_21 = arith.constant 0 : index
    %c0_22 = arith.constant 0 : index
    %38 = vector.load %arg8[%c0_21, %c0_22] : memref<16x8xf32, #tpu.memory_space<vmem>>, vector<16x8xf32>
    tpu.vector_store %arg8[%c0_21, %c0_22], %37 {strides = array<i32>} : memref<16x8xf32, #tpu.memory_space<vmem>>, vector<16x8xf32>,
    return
  }
  func.func @transform_0(%arg0: i32) -> (i32, i32) {
    %c0_i32 = arith.constant 0 : i32
    %c0_i32_0 = arith.constant 0 : i32
    return %arg0, %c0_i32 : i32, i32
  }
  func.func @transform_1(%arg0: i32) -> (i32, i32) {
    %c0_i32 = arith.constant 0 : i32
    %c0_i32_0 = arith.constant 0 : i32
    %c0_i32_1 = arith.constant 0 : i32
    return %c0_i32, %c0_i32_0 : i32, i32
  }
  func.func @transform_2(%arg0: i32) -> (i32, i32) {
    %c0_i32 = arith.constant 0 : i32
    %c0_i32_0 = arith.constant 0 : i32
    %c0_i32_1 = arith.constant 0 : i32
    return %c0_i32, %c0_i32_0 : i32, i32
  }
  func.func @transform_3(%arg0: i32) -> (i32, i32) {
    %c0_i32 = arith.constant 0 : i32
    %c0_i32_0 = arith.constant 0 : i32
    %c0_i32_1 = arith.constant 0 : i32
    return %c0_i32, %c0_i32_0 : i32, i32
  }
  func.func @transform_4(%arg0: i32) -> (i32, i32) {
    %c0_i32 = arith.constant 0 : i32
    %c0_i32_0 = arith.constant 0 : i32
    %c0_i32_1 = arith.constant 0 : i32
    return %c0_i32, %c0_i32_0 : i32, i32
  }
  func.func @transform_5(%arg0: i32) -> (i32, i32) {
    %c0_i32 = arith.constant 0 : i32
    %c0_i32_0 = arith.constant 0 : i32
    %c0_i32_1 = arith.constant 0 : i32
    return %c0_i32, %c0_i32_0 : i32, i32
  }
  func.func @transform_6(%arg0: i32) -> (i32, i32) {
    %c0_i32 = arith.constant 0 : i32
    %c0_i32_0 = arith.constant 0 : i32
    %c0_i32_1 = arith.constant 0 : i32
    return %c0_i32, %c0_i32_0 : i32, i32
  }
  func.func @transform_7(%arg0: i32) -> (i32, i32) {
    %c0_i32 = arith.constant 0 : i32
    %c0_i32_0 = arith.constant 0 : i32
    return %arg0, %c0_i32 : i32, i32
  }
}

</mosaic_0001>

<bundles_post_ra>
// kernel: actor_critic_forward.1
= control target key start
LH: loop header
LB: loop body
LE: loop exit
PB: predicated region body
PF: predicated region fallthrough
CT: control target
= control target key end

     0   :  { %12 = vsyncpa [#allocation3], 0  ;;  %s445_s0 = inlined_call_operand.vmem [shape: f32[16,16], index: 0, kind: input, shape index: {}]   ;;  %s446_s1 = inlined_call_operand.vmem [shape: f32[16,128], index: 1, kind: input, shape index: {}]   ;;  %s447_s2 = inlined_call_operand.vmem [shape: f32[1,128], index: 2, kind: input, shape index: {}]   ;;  %s448_s3 = inlined_call_operand.hbm [shape: f32[128,128], index: 3, kind: input, shape index: {}]   ;;  %s449_s4 = inlined_call_operand.vmem [shape: f32[1,128], index: 4, kind: input, shape index: {}]   ;;  %s450_s5 = inlined_call_operand.hbm [shape: f32[128,128], index: 5, kind: input, shape index: {}]   ;;  %s451_s6 = inlined_call_operand.vmem [shape: f32[1,128], index: 6, kind: input, shape index: {}]   ;;  %s452_s7 = inlined_call_operand.vmem [shape: f32[16,8], index: 7, kind: output, shape index: {}]  }
   0x1   :  { %s24_s26 = sshll.u32 %s448_s3, 4  ;;  %s25_s26 = int_to_ptr.hbm [resolvable:$true] %s24_s26 }
   0x2   :  { %13 = vsyncpa [#allocation5], 0  ;;  %s349_s27 = smov [#allocation2]   ;;  %s39_s8 = sshll.u32 %s450_s5, 4  ;;  %s40_s8 = int_to_ptr.hbm [resolvable:$true] %s39_s8 }
   0x3   :  { %s26_s28 = sshll.u32 %s349_s27, 4  ;;  %s350_s9 = smov 128   ;;  %s27_s28 = int_to_ptr.vmem [resolvable:$true] %s26_s28 }
   0x4   :  { %s351_s10 = smov 8   ;;  %s352_s11 = smov [#allocation4]  }
   0x5   :  { %32 = dma.hbm_to_vmem [thread:$0]  %s25_s26, 2048, %s27_s28, [#allocation3], %s350_s9, %s350_s9, %s351_s10  }
   0x6   :  { %s41_s12 = sshll.u32 %s352_s11, 4  ;;  %s42_s12 = int_to_ptr.vmem [resolvable:$true] %s41_s12 }
   0x7   :  { %47 = dma.hbm_to_vmem [thread:$0]  %s40_s8, 2048, %s42_s12, [#allocation5], %s350_s9, %s350_s9, %s351_s10  }
   0x8   :  { %345 = dma.done.wait [#allocation3], 2048  }
   0x9   :  { %346 = vsyncadd [#allocation3], 4294965248 }
   0xa   :  { %347 = dma.done.wait [#allocation5], 2048  }
   0xb   :  { %348 = vsyncadd [#allocation5], 4294965248  ;;  %v61_v0 = vld [vmem:[%s446_s1 + $0x8] sm:$0xff]  ;;  %v60_v1 = vld [vmem:[%s446_s1] sm:$0xff]  ;;  %vm66_vm0 = vcmask 130048   ;;  %v186_v50 = vlaneseq  ;;  %vm239_vm6 = vcmask 64512  }
   0xc   :  { %87 = vmatpush.msra.mxu0 %v61_v0  ;;  %v58_v2 = vld [vmem:[%s445_s0] sm:$0xff]  ;;  %v113_v3 = vld [vmem:[#allocation2 + $0x78] sm:$0xff]  ;;  %v112_v4 = vld [vmem:[#allocation2 + $0x70] sm:$0xff] }
   0xd   :  { %118 = vmatpush.msra.mxu1 %v113_v3  ;;  %250 = vmatpush.msra.mxu3 %v113_v3  ;;  %v111_v5 = vld [vmem:[#allocation2 + $0x68] sm:$0xff]  ;;  %v110_v6 = vld [vmem:[#allocation2 + $0x60] sm:$0xff]  ;;  %v109_v7 = vld [vmem:[#allocation2 + $0x58] sm:$0xff]  ;;  %v419_v51 = vand.u32 127, %v186_v50 }
   0xe   :  { %88 = vmatpush.msra.mxu0 %v60_v1  ;;  %v59_v8 = vld [vmem:[%s445_s0 + $0x8] sm:$0xff]  ;;  %v108_v9 = vld [vmem:[#allocation2 + $0x50] sm:$0xff]  ;;  %v106_v11 = vld [vmem:[#allocation2 + $0x40] sm:$0xff] }
   0xf   :  { %248 = vmatmul.msk.f32.vlgmr.msra.gmra.mxu0 %vm66_vm0, %v58_v2  ;;  %119 = vmatpush.msra.mxu1 %v112_v4  ;;  %v107_v10 = vld [vmem:[#allocation2 + $0x48] sm:$0xff]  ;;  %v105_v12 = vld [vmem:[#allocation2 + $0x38] sm:$0xff]  ;;  %v104_v13 = vld [vmem:[#allocation2 + $0x30] sm:$0xff]  ;;  %vm188_vm1 = vcmp.lt.s32.totalorder %v419_v51, 4 }
  0x10   :  { %251 = vmatpush.msra.mxu3 %v112_v4  ;;  %v103_v14 = vld [vmem:[#allocation2 + $0x28] sm:$0xff]  ;;  %v102_v15 = vld [vmem:[#allocation2 + $0x20] sm:$0xff]  ;;  %v101_v16 = vld [vmem:[#allocation2 + $0x18] sm:$0xff] }
  0x11   :  { %120 = vmatpush.msra.mxu1 %v111_v5  ;;  %v100_v17 = vld [vmem:[#allocation2 + $0x10] sm:$0xff]  ;;  %v99_v18 = vld [vmem:[#allocation2 + $0x8] sm:$0xff]  ;;  %v98_v19 = vld [vmem:[#allocation2] sm:$0xff] }
  0x12   :  { %252 = vmatpush.msra.mxu3 %v111_v5  ;;  %v158_v20 = vld [vmem:[#allocation4 + $0x78] sm:$0xff]  ;;  %v157_v21 = vld [vmem:[#allocation4 + $0x70] sm:$0xff]  ;;  %v156_v22 = vld [vmem:[#allocation4 + $0x68] sm:$0xff] }
  0x13   :  { %121 = vmatpush.msra.mxu1 %v110_v6  ;;  %163 = vmatpush.msrb.mxu0 %v158_v20  ;;  %v155_v23 = vld [vmem:[#allocation4 + $0x60] sm:$0xff]  ;;  %v154_v24 = vld [vmem:[#allocation4 + $0x58] sm:$0xff]  ;;  %v153_v25 = vld [vmem:[#allocation4 + $0x50] sm:$0xff] }
  0x14   :  { %253 = vmatpush.msra.mxu3 %v110_v6  ;;  %266 = vmatpush.msra.mxu2 %v158_v20  ;;  %v152_v26 = vld [vmem:[#allocation4 + $0x48] sm:$0xff]  ;;  %v151_v27 = vld [vmem:[#allocation4 + $0x40] sm:$0xff]  ;;  %v150_v28 = vld [vmem:[#allocation4 + $0x38] sm:$0xff] }
  0x15   :  { %122 = vmatpush.msra.mxu1 %v109_v7  ;;  %164 = vmatpush.msrb.mxu0 %v157_v21  ;;  %v286_v29 = vld [vmem:[%s447_s2] ss:$0 sm:$0xff]  ;;  %v149_v30 = vld [vmem:[#allocation4 + $0x30] sm:$0xff]  ;;  %v148_v31 = vld [vmem:[#allocation4 + $0x28] sm:$0xff] }
  0x16   :  { %254 = vmatpush.msra.mxu3 %v109_v7  ;;  %267 = vmatpush.msra.mxu2 %v157_v21  ;;  %v147_v34 = vld [vmem:[#allocation4 + $0x20] sm:$0xff]  ;;  %v146_v36 = vld [vmem:[#allocation4 + $0x18] sm:$0xff]  ;;  %v145_v40 = vld [vmem:[#allocation4 + $0x10] sm:$0xff] }
  0x17   :  { %249 = vmatmul.msk.f32.gmra.mxu0 %vm66_vm0, %v59_v8  ;;  %123 = vmatpush.msra.mxu1 %v108_v9  ;;  %v144_v41 = vld [vmem:[#allocation4 + $0x8] sm:$0xff]  ;;  %v143_v42 = vld [vmem:[#allocation4] sm:$0xff] }
  0x18   :  { %255 = vmatpush.msra.mxu3 %v108_v9  ;;  %165 = vmatpush.msrb.mxu0 %v156_v22  ;;  %v287_v43 = vld [vmem:[%s449_s4] ss:$0 sm:$0xff] }
  0x19   :  { %124 = vmatpush.msra.mxu1 %v107_v10  ;;  %268 = vmatpush.msra.mxu2 %v156_v22  ;;  %v288_v52 = vld [vmem:[%s451_s6] ss:$0 sm:$0xff] }
  0x1a   :  { %256 = vmatpush.msra.mxu3 %v107_v10  ;;  %166 = vmatpush.msrb.mxu0 %v155_v23 }
  0x1b   :  { %125 = vmatpush.msra.mxu1 %v106_v11  ;;  %269 = vmatpush.msra.mxu2 %v155_v23 }
  0x1c   :  { %257 = vmatpush.msra.mxu3 %v106_v11  ;;  %167 = vmatpush.msrb.mxu0 %v154_v24 }
  0x1d   :  { %126 = vmatpush.msra.mxu1 %v105_v12  ;;  %270 = vmatpush.msra.mxu2 %v154_v24 }
  0x1e   :  { %258 = vmatpush.msra.mxu3 %v105_v12  ;;  %168 = vmatpush.msrb.mxu0 %v153_v25 }
  0x1f   :  { %127 = vmatpush.msra.mxu1 %v104_v13  ;;  %271 = vmatpush.msra.mxu2 %v153_v25 }
  0x20   :  { %259 = vmatpush.msra.mxu3 %v104_v13  ;;  %169 = vmatpush.msrb.mxu0 %v152_v26 }
  0x21   :  { %128 = vmatpush.msra.mxu1 %v103_v14  ;;  %272 = vmatpush.msra.mxu2 %v152_v26 }
  0x22   :  { %260 = vmatpush.msra.mxu3 %v103_v14  ;;  %170 = vmatpush.msrb.mxu0 %v151_v27 }
  0x23   :  { %129 = vmatpush.msra.mxu1 %v102_v15  ;;  %273 = vmatpush.msra.mxu2 %v151_v27 }
  0x24   :  { %261 = vmatpush.msra.mxu3 %v102_v15  ;;  %171 = vmatpush.msrb.mxu0 %v150_v28 }
  0x25   :  { %130 = vmatpush.msra.mxu1 %v101_v16  ;;  %274 = vmatpush.msra.mxu2 %v150_v28 }
  0x26   :  { %262 = vmatpush.msra.mxu3 %v101_v16  ;;  %172 = vmatpush.msrb.mxu0 %v149_v30 }
  0x27   :  { %131 = vmatpush.msra.mxu1 %v100_v17  ;;  %275 = vmatpush.msra.mxu2 %v149_v30 }
  0x28   :  { %263 = vmatpush.msra.mxu3 %v100_v17  ;;  %173 = vmatpush.msrb.mxu0 %v148_v31 }
  0x29   :  { %132 = vmatpush.msra.mxu1 %v99_v18  ;;  %276 = vmatpush.msra.mxu2 %v148_v31 }
  0x2a   :  { %264 = vmatpush.msra.mxu3 %v99_v18  ;;  %174 = vmatpush.msrb.mxu0 %v147_v34 }
  0x2b   :  { %133 = vmatpush.msra.mxu1 %v98_v19  ;;  %277 = vmatpush.msra.mxu2 %v147_v34 }
  0x2c   :  { %265 = vmatpush.msra.mxu3 %v98_v19  ;;  %175 = vmatpush.msrb.mxu0 %v146_v36 }
  0x2d   :  { %278 = vmatpush.msra.mxu2 %v146_v36 }
  0x2e   :  { %176 = vmatpush.msrb.mxu0 %v145_v40 }
  0x2f   :  { %279 = vmatpush.msra.mxu2 %v145_v40 }
  0x30   :  { %177 = vmatpush.msrb.mxu0 %v144_v41 }
  0x31   :  { %280 = vmatpush.msra.mxu2 %v144_v41 }
  0x32   :  { %178 = vmatpush.msrb.mxu0 %v143_v42 }
  0x33   :  { %281 = vmatpush.msra.mxu2 %v143_v42 }
  0x8c   :  { %v90_v32 = vpop.f32.mrf.mxu0 }
  0x8d   :  { %v91_v33 = vadd.f32 %v286_v29, %v90_v32 }
  0x8f   :  { %v96_v35 = vmax.f32 %v91_v33, 0.0 }
  0x91   :  { %134 = vmatmul.f32.vlgmr.msra.gmra.mxu1 %v96_v35 }
  0x94   :  { %v93_v37 = vpop.f32.mrf.mxu0 }
  0x95   :  { %v94_v38 = vadd.f32 %v286_v29, %v93_v37 }
  0x97   :  { %v97_v39 = vmax.f32 %v94_v38, 0.0 }
  0x99   :  { %137 = vmatmul.f32.vlgmr.msra.gmra.mxu3 %v97_v39 }
 0x10e   :  { %v135_v44 = vpop.f32.mrf.mxu1 }
 0x10f   :  { %v136_v45 = vadd.f32 %v287_v43, %v135_v44 }
 0x111   :  { %v141_v46 = vmax.f32 %v136_v45, 0.0 }
 0x113   :  { %179 = vmatmul.f32.vlgmr.msrb.gmra.mxu0 %v141_v46 }
 0x11c   :  { %v138_v47 = vpop.f32.mrf.mxu3 }
 0x11d   :  { %v139_v48 = vadd.f32 %v287_v43, %v138_v47 }
 0x11f   :  { %v142_v49 = vmax.f32 %v139_v48, 0.0 }
 0x121   :  { %182 = vmatmul.f32.vlgmr.msra.gmra.mxu2 %v142_v49 }
 0x190   :  { %v180_v53 = vpop.f32.mrf.mxu0 }
 0x191   :  { %v181_v54 = vadd.f32 %v288_v52, %v180_v53 }
 0x193   :  { %v189_v55 = vsel %vm188_vm1, %v181_v54, -1e+30 }
 0x194   :  { %191 = vmax.xlane.f32.xlu0 %v189_v55 }
 0x1a4   :  { %v183_v56 = vpop.f32.mrf.mxu2 }
 0x1a5   :  { %v184_v57 = vadd.f32 %v288_v52, %v183_v56 }
 0x1a7   :  { %v190_v58 = vsel %vm188_vm1, %v184_v57, -1e+30 }
 0x1a8   :  { %193 = vmax.xlane.f32.xlu0 %v190_v58 }
 0x207   :  { %v192_v59 = vpop.xlane.xlu0 %191 }
 0x208   :  { %v195_v60 = vsub.f32 %v189_v55, %v192_v59 }
 0x20a   :  { %v197_v61 = vmul.f32 1.442695, %v195_v60 }
 0x20c   :  { %289 = vpow2.f32 %v197_v61 }
 0x212   :  { %v290_v62 = vpop.eup %289 }
 0x213   :  { %v201_v63 = vsel %vm188_vm1, %v290_v62, 0.0 }
 0x214   :  { %203 = vadd.xlane.f32.xlu1 %v201_v63 }
 0x21b   :  { %v194_v0 = vpop.xlane.xlu0 %193 }
 0x21c   :  { %v196_v1 = vsub.f32 %v190_v58, %v194_v0 }
 0x21e   :  { %v199_v2 = vmul.f32 1.442695, %v196_v1 }
 0x220   :  { %291 = vpow2.f32 %v199_v2 }
 0x226   :  { %v292_v3 = vpop.eup %291 }
 0x227   :  { %v202_v4 = vsel %vm188_vm1, %v292_v3, 0.0 }
 0x228   :  { %205 = vadd.xlane.f32.xlu1 %v202_v4 }
 0x287   :  { %v204_v5 = vpop.xlane.xlu1 %203 }
 0x288   :  { %293 = vrcp.f32 %v204_v5  ;;  %v218_v9 = vand.u32 2147483648, %v204_v5  ;;  %v216_v11 = vand.u32 2147483647, %v204_v5  ;;  %vm212_vm3 = vweird.f32 %v204_v5 }
 0x28a   :  { %v219_v13 = vor.u32 1.1754944e-38, %v218_v9  ;;  %vm217_vm5 = vcmp.eq.f32.partialorder %v216_v11, 8.507059e+37 }
 0x28e   :  { %v294_v6 = vpop.eup %293 }
 0x28f   :  { %v208_v7 = vmul.f32 %v294_v6, %v204_v5  ;;  %vm213_vm2 = vweird.f32 %v294_v6 }
 0x290   :  { %vm214_vm4 = vmor %vm212_vm3, %vm213_vm2 }
 0x291   :  { %v209_v8 = vsub.f32 1.0, %v208_v7 }
 0x293   :  { %v210_v10 = vmul.f32 %v294_v6, %v209_v8 }
 0x295   :  { %v211_v12 = vadd.f32 %v294_v6, %v210_v10 }
 0x297   :  { %v215_v14 = vsel %vm214_vm4, %v294_v6, %v211_v12 }
 0x298   :  { %v220_v15 = vsel %vm217_vm5, %v219_v13, %v215_v14 }
 0x299   :  { %v221_v16 = vmul.f32 %v220_v15, %v201_v63 }
 0x29b   :  { %v237_v17 = vsel %vm188_vm1, %v221_v16, %v181_v54  ;;  %v206_v18 = vpop.xlane.xlu1 %205 }
 0x29c   :  { %240 = vst.msk [vmem:[%s452_s7] sm:$0xff] %vm239_vm6, %v237_v17  ;;  %295 = vrcp.f32 %v206_v18  ;;  %v233_v22 = vand.u32 2147483648, %v206_v18  ;;  %v231_v24 = vand.u32 2147483647, %v206_v18  ;;  %vm227_vm8 = vweird.f32 %v206_v18 }
 0x29e   :  { %v234_v26 = vor.u32 1.1754944e-38, %v233_v22  ;;  %vm232_vm10 = vcmp.eq.f32.partialorder %v231_v24, 8.507059e+37 }
 0x2a2   :  { %v296_v19 = vpop.eup %295 }
 0x2a3   :  { %v223_v20 = vmul.f32 %v296_v19, %v206_v18  ;;  %vm228_vm7 = vweird.f32 %v296_v19 }
 0x2a4   :  { %vm229_vm9 = vmor %vm227_vm8, %vm228_vm7 }
 0x2a5   :  { %v224_v21 = vsub.f32 1.0, %v223_v20 }
 0x2a7   :  { %v225_v23 = vmul.f32 %v296_v19, %v224_v21 }
 0x2a9   :  { %v226_v25 = vadd.f32 %v296_v19, %v225_v23 }
 0x2ab   :  { %v230_v27 = vsel %vm229_vm9, %v296_v19, %v226_v25 }
 0x2ac   :  { %v235_v28 = vsel %vm232_vm10, %v234_v26, %v230_v27 }
 0x2ad   :  { %v236_v29 = vmul.f32 %v235_v28, %v202_v4 }
 0x2af   :  { %v238_v30 = vsel %vm188_vm1, %v236_v29, %v184_v57 }
 0x2b0   :  { %241 = vst.msk [vmem:[%s452_s7 + $0x8] sm:$0xff] %vm239_vm6, %v238_v30 }
 0x2b1   :  { %246 = vsyncpa [#allocation3], 1 }
 0x2b2   :  { %247 = vsyncpa [#allocation5], 1 }

</bundles_post_ra>
